<compile_context>
chip_gen: v7x
topology: tpu7x:2x2x1
jax: 0.10.0
libtpu: 0.0.40
codegen_flags: <defaults>
</compile_context>

<pallas_src>
import jax
import jax.numpy as jnp
from jax.experimental import pallas as pl
from jax.experimental.pallas import tpu as pltpu


def _round_up(a: int, b: int) -> int:
    return ((a + b - 1) // b) * b


def _minibatch_std2d_kernel(x_ref, o_ref):
    # Block shapes: (N, C, T), T a multiple of 128 lanes.
    x = x_ref[...]                                            # source dtype
    # Pass all channels through unchanged (no f32 round-trip for pass-through data).
    o_ref[...] = x

    n = x.shape[0]
    xf = x.astype(jnp.float32)

    # Unbiased std over the batch dim (matches torch.std default, correction=1).
    # NOTE: n == 1 gives inf/nan (divide by n-1 == 0), same as PyTorch.
    mean_b = jnp.mean(xf, axis=0, keepdims=True)              # (1, C, T)
    var_b = jnp.sum((xf - mean_b) ** 2, axis=0) / (n - 1)     # (C, T)
    std_b = jnp.sqrt(var_b)                                   # (C, T)

    # Mean over channels -> (1, T). Small sublane reduce (XLU), once per tile.
    mb_std = jnp.mean(std_b, axis=0, keepdims=True)           # (1, T)

    # Overwrite only channel 0: x[:, 0] += mb_std (broadcast over batch).
    c0 = xf[:, 0:1, :] + mb_std[None, :, :]                   # (N, 1, T)
    o_ref[:, 0:1, :] = c0.astype(o_ref.dtype)


def minibatch_std2d(x, *, max_block_bytes=2 * 1024 * 1024):
    """Pallas implementation of MiniBatchStd2d.forward. x: (N, C, H, W)."""
    n, c, h, w = x.shape
    hw = h * w
    itemsize = jnp.dtype(x.dtype).itemsize

    # Spatial tile: multiple of 128 lanes, capped so that
    # 2 specs x 2 pipeline buffers x block + f32 temporaries fit every chip's
    # scoped-VMEM default (conservative cap works on v5e/v6e/v7x without raising
    # vmem_limit_bytes).
    t_cap = max(128, (max_block_bytes // (n * c * itemsize)) // 128 * 128)
    tile = min(_round_up(hw, 128), t_cap)
    hw_pad = _round_up(hw, tile)

    x3 = x.reshape(n, c, hw)
    if hw_pad != hw:
        # Zero padding is inert: every lane's reduction (over N and C only) is
        # independent of other lanes, and the pad is sliced off below.
        x3 = jnp.pad(x3, ((0, 0), (0, 0), (0, hw_pad - hw)))

    grid = (hw_pad // tile,)

    out3 = pl.pallas_call(
        _minibatch_std2d_kernel,
        out_shape=jax.ShapeDtypeStruct((n, c, hw_pad), x.dtype),
        grid=grid,
        in_specs=[pl.BlockSpec((n, c, tile), lambda s: (0, 0, s))],
        out_specs=pl.BlockSpec((n, c, tile), lambda s: (0, 0, s)),
        input_output_aliases={0: 0},
        compiler_params=pltpu.CompilerParams(
            dimension_semantics=("parallel",),
        ),
        cost_estimate=pl.CostEstimate(
            flops=6 * n * c * hw_pad,
            transcendentals=c * hw_pad,
            bytes_accessed=2 * n * c * hw_pad * itemsize,
        ),
    )(x3)

    if hw_pad != hw:
        out3 = out3[:, :, :hw]
    return out3.reshape(n, c, h, w)


def _reference(x):
    # Pure-JAX reference mirroring the PyTorch module.
    std_b = jnp.std(x.astype(jnp.float32), axis=0, ddof=1)    # (C, H, W)
    mb_std = jnp.mean(std_b, axis=0)                          # (H, W)
    return x.at[:, 0].add(mb_std.astype(x.dtype)).astype(x.dtype)


if __name__ == "__main__":
    key = jax.random.PRNGKey(0)

    # Main case from the module spec: (N=2, C=4, H=16, W=16) -> H*W = 256 lanes.
    x = jax.random.normal(key, (2, 4, 16, 16), dtype=jnp.float32)
    ref = jax.block_until_ready(_reference(x))
    out = jax.block_until_ready(minibatch_std2d(x))
    assert out.shape == x.shape and out.dtype == x.dtype
    assert jnp.allclose(out, ref, rtol=1e-5, atol=1e-5), "mismatch vs reference (256-lane case)"

    # Ragged spatial extent (H*W = 60, not a multiple of 128) exercises padding.
    x2 = jax.random.normal(jax.random.PRNGKey(1), (2, 4, 6, 10), dtype=jnp.float32)
    ref2 = jax.block_until_ready(_reference(x2))
    out2 = jax.block_until_ready(minibatch_std2d(x2))
    assert out2.shape == x2.shape and out2.dtype == x2.dtype
    assert jnp.allclose(out2, ref2, rtol=1e-5, atol=1e-5), "mismatch vs reference (padded case)"

    print("KERNEL_OK")
</pallas_src>

<mosaic_0001>
module attributes {stable_mosaic.version = 11 : i64} {
  func.func @_minibatch_std2d_kernel(%arg0: i32, %arg1: memref<2x4x256xf32, #tpu.memory_space<vmem>>, %arg2: memref<2x4x256xf32, #tpu.memory_space<vmem>>) attributes {dimension_semantics = [#tpu.dimension_semantics<parallel>], iteration_bounds = array<i64: 1>, scalar_prefetch = 0 : i64, scratch_operands = 0 : i64, tpu.core_type = #tpu.core_type<tc>, window_params = [{transform_indices = @transform_0, window_bounds = array<i64: 2, 4, 256>}, {transform_indices = @transform_1, window_bounds = array<i64: 2, 4, 256>}]} {
    %c0 = arith.constant 0 : index
    %c0_0 = arith.constant 0 : index
    %c0_1 = arith.constant 0 : index
    %0 = vector.load %arg1[%c0, %c0_0, %c0_1] : memref<2x4x256xf32, #tpu.memory_space<vmem>>, vector<2x4x256xf32>
    %c0_2 = arith.constant 0 : index
    %c0_3 = arith.constant 0 : index
    %c0_4 = arith.constant 0 : index
    %1 = vector.load %arg2[%c0_2, %c0_3, %c0_4] : memref<2x4x256xf32, #tpu.memory_space<vmem>>, vector<2x4x256xf32>
    tpu.vector_store %arg2[%c0_2, %c0_3, %c0_4], %0 {strides = array<i32>} : memref<2x4x256xf32, #tpu.memory_space<vmem>>, vector<2x4x256xf32>,
    %cst = arith.constant dense<0.000000e+00> : vector<4x256xf32>
    %2 = vector.multi_reduction <add>, %0, %cst [0] : vector<2x4x256xf32> to vector<4x256xf32>
    %3 = vector.shape_cast %2 : vector<4x256xf32> to vector<1x4x256xf32>
    %cst_5 = arith.constant 2.000000e+00 : f32
    %4 = vector.broadcast %cst_5 : f32 to vector<1x4x256xf32>
    %5 = arith.divf %3, %4 : vector<1x4x256xf32>
    %6 = vector.broadcast %5 : vector<1x4x256xf32> to vector<2x4x256xf32>
    %7 = arith.subf %0, %6 : vector<2x4x256xf32>
    %8 = arith.mulf %7, %7 : vector<2x4x256xf32>
    %cst_6 = arith.constant dense<0.000000e+00> : vector<4x256xf32>
    %9 = vector.multi_reduction <add>, %8, %cst_6 [0] : vector<2x4x256xf32> to vector<4x256xf32>
    %cst_7 = arith.constant 1.000000e+00 : f32
    %10 = vector.broadcast %cst_7 : f32 to vector<4x256xf32>
    %11 = arith.divf %9, %10 : vector<4x256xf32>
    %12 = math.sqrt %11 : vector<4x256xf32>
    %cst_8 = arith.constant dense<0.000000e+00> : vector<256xf32>
    %13 = vector.multi_reduction <add>, %12, %cst_8 [0] : vector<4x256xf32> to vector<256xf32>
    %14 = vector.shape_cast %13 : vector<256xf32> to vector<1x256xf32>
    %cst_9 = arith.constant 4.000000e+00 : f32
    %15 = vector.broadcast %cst_9 : f32 to vector<1x256xf32>
    %16 = arith.divf %14, %15 : vector<1x256xf32>
    %17 = vector.extract_strided_slice %0 {offsets = [0, 0, 0], sizes = [2, 1, 256], strides = [1, 1, 1]} : vector<2x4x256xf32> to vector<2x1x256xf32>
    %18 = vector.shape_cast %16 : vector<1x256xf32> to vector<1x1x256xf32>
    %19 = vector.broadcast %18 : vector<1x1x256xf32> to vector<2x1x256xf32>
    %20 = arith.addf %17, %19 : vector<2x1x256xf32>
    %c0_10 = arith.constant 0 : index
    %c0_11 = arith.constant 0 : index
    %c0_12 = arith.constant 0 : index
    %21 = vector.load %arg2[%c0_10, %c0_11, %c0_12] : memref<2x4x256xf32, #tpu.memory_space<vmem>>, vector<2x1x256xf32>
    tpu.vector_store %arg2[%c0_10, %c0_11, %c0_12], %20 {strides = array<i32>} : memref<2x4x256xf32, #tpu.memory_space<vmem>>, vector<2x1x256xf32>,
    return
  }
  func.func @transform_0(%arg0: i32) -> (i32, i32, i32) {
    %c0_i32 = arith.constant 0 : i32
    %c0_i32_0 = arith.constant 0 : i32
    %c0_i32_1 = arith.constant 0 : i32
    return %c0_i32, %c0_i32_0, %arg0 : i32, i32, i32
  }
  func.func @transform_1(%arg0: i32) -> (i32, i32, i32) {
    %c0_i32 = arith.constant 0 : i32
    %c0_i32_0 = arith.constant 0 : i32
    %c0_i32_1 = arith.constant 0 : i32
    return %c0_i32, %c0_i32_0, %arg0 : i32, i32, i32
  }
}

</mosaic_0001>

<bundles_post_ra>
// kernel: tpu_custom_call.1
= control target key start
LH: loop header
LB: loop body
LE: loop exit
PB: predicated region body
PF: predicated region fallthrough
CT: control target
= control target key end

     0   :  { %6 = vsyncpa [#allocation3], 0  ;;  %s286_s0 = inlined_call_operand.hbm [shape: f32[2,4,256], index: 0, kind: input, shape index: {}, may-alias: {0,1}]   ;;  %s287_s1 = inlined_call_operand.hbm [shape: f32[2,4,256], index: 1, kind: output, shape index: {}, may-alias: {0,1}]  }
   0x1   :  { %7 = vsyncpa [#allocation4], 0  ;;  %s215_s6 = smov [#allocation2]   ;;  %s167_s10 = scalar_lea.hbm %s286_s0, 256 }
   0x2   :  { %s13_s7 = sshll.u32 %s215_s6, 4  ;;  %p168_p0 = scmp.ne.s32.totalorder %s286_s0, %s167_s10  ;;  %s14_s7 = int_to_ptr.vmem [resolvable:$true] %s13_s7 }
   0x3   :  { %p171_p1 = scmp.lt.u32.totalorder %s167_s10, %s286_s0 }
   0x5   :  { %p173_p2 = pnand %p171_p1, %p168_p0 }
   0x7   :  { %176 = shalt.err (!%p173_p2)
}
   0x8   :  { %s177_s15 = scalar_lea.vmem %s14_s7, 256  ;;  %p182_p4 = scmp.lt.s32.totalorder %s14_s7, %s14_s7 }
   0x9   :  { %p178_p3 = scmp.ne.s32.totalorder %s14_s7, %s177_s15  ;;  %p183_p5 = scmp.lt.s32.totalorder %s177_s15, %s177_s15 }
   0xb   :  { %p184_p6 = por %p183_p5, %p182_p4 }
   0xd   :  { %p185_p7 = pnand %p184_p6, %p178_p3 }
   0xf   :  { %188 = shalt.err (!%p185_p7)
}
  0x10   :  { %s216_s16 = smov 128   ;;  %s217_s17 = smov 8  }
  0x11   :  { %19 = dma.hbm_to_vmem [thread:$0]  %s286_s0, 256, %s14_s7, [#allocation3], %s216_s16, %s216_s16, %s217_s17  }
  0x12   :  { %211 = dma.done.wait [#allocation3], 256  }
  0x13   :  { %212 = vsyncadd [#allocation3], 4294967040  ;;  %vm33_vm0 = vcmask 1043456   ;;  %v245_v0 = vld [vmem:[#allocation2] sm:$0xff]  ;;  %v247_v1 = vld [vmem:[#allocation2 + $0x8] sm:$0xff]  ;;  %v105_v48 = vlaneseq  ;;  %s219_s0 = smov [#allocation5]  }
  0x14   :  { %25 = vst [vmem:[#allocation5] sm:$0xff] %v245_v0  ;;  %v29_v2 = vcombine.high %v245_v0, %v245_v0  ;;  %v34_v3 = vsel %vm33_vm0, %v245_v0, 0.0  ;;  %26 = vst [vmem:[#allocation5 + $0x8] sm:$0xff] %v247_v1  ;;  %v30_v4 = vcombine.high %v247_v1, %v247_v1  ;;  %v35_v5 = vsel %vm33_vm0, %v247_v1, 0.0  ;;  %s144_s20 = sshll.u32 %s219_s0, 4  ;;  %s145_s20 = int_to_ptr.vmem [resolvable:$true] %s144_s20 }
  0x15   :  { %v36_v6 = vadd.f32 %v35_v5, %v34_v3  ;;  %v218_v46 = vmov 1966171168   ;;  %v106_v54 = vshrl.u32 %v105_v48, 7  ;;  %vm134_vm5 = vcmp.lt.s32.totalorder %v105_v48, 256  ;;  %s189_s21 = scalar_lea.vmem %s145_s20, 256  ;;  %p194_p9 = scmp.lt.s32.totalorder %s145_s20, %s145_s20 }
  0x16   :  { %v37_v7 = vsel %vm33_vm0, %v29_v2, 0.0  ;;  %v38_v8 = vsel %vm33_vm0, %v30_v4, 0.0  ;;  %v103_v47 = vunpack.c.l.s4 %v218_v46  ;;  %p190_p8 = scmp.ne.s32.totalorder %s145_s20, %s189_s21  ;;  %p195_p10 = scmp.lt.s32.totalorder %s189_s21, %s189_s21 }
  0x17   :  { %v39_v9 = vadd.f32 %v38_v8, %v37_v7  ;;  %v41_v10 = vmul.f32 0.5, %v36_v6 }
  0x18   :  { %v104_v53 = vunpack.c.0.s8 %v103_v47  ;;  %p196_p11 = por %p195_p10, %p194_p9 }
  0x19   :  { %v42_v11 = vmul.f32 0.5, %v39_v9 }
  0x1a   :  { %v107_v57 = vsub.s32 %v104_v53, %v106_v54  ;;  %p197_p12 = pnand %p196_p11, %p190_p8 }
  0x1b   :  { %v45_v12 = vcombine.low %v41_v10, %v42_v11 }
  0x1d   :  { %v47_v13 = vsub.f32 %v245_v0, %v45_v12  ;;  %v48_v14 = vsub.f32 %v247_v1, %v45_v12 }
  0x1f   :  { %v49_v15 = vmul.f32 %v47_v13, %v47_v13  ;;  %v50_v16 = vmul.f32 %v48_v14, %v48_v14 }
  0x21   :  { %v53_v17 = vcombine.high %v49_v15, %v49_v15  ;;  %v54_v18 = vcombine.high %v50_v16, %v50_v16  ;;  %v57_v19 = vsel %vm33_vm0, %v49_v15, 0.0  ;;  %v58_v20 = vsel %vm33_vm0, %v50_v16, 0.0 }
  0x22   :  { %v59_v21 = vadd.f32 %v58_v20, %v57_v19 }
  0x23   :  { %v60_v22 = vsel %vm33_vm0, %v53_v17, 0.0  ;;  %v61_v23 = vsel %vm33_vm0, %v54_v18, 0.0 }
  0x24   :  { %v62_v24 = vadd.f32 %v61_v23, %v60_v22  ;;  %163 = vrsqrt.f32 %v59_v21  ;;  %vm65_vm1 = vcmp.eq.f32.partialorder %v59_v21, inf  ;;  %v68_v26 = vand.u32 2147483648, %v59_v21 }
  0x25   :  { %vm67_vm2 = vcmp.eq.f32.partialorder %v59_v21, 0.0 }
  0x26   :  { %165 = vrsqrt.f32 %v62_v24  ;;  %vm72_vm3 = vcmp.eq.f32.partialorder %v62_v24, inf  ;;  %v75_v29 = vand.u32 2147483648, %v62_v24  ;;  %vm74_vm4 = vcmp.eq.f32.partialorder %v62_v24, 0.0 }
  0x2e   :  { %v164_v25 = vpop.eup %163 }
  0x2f   :  { %v64_v27 = vmul.f32 %v164_v25, %v59_v21 }
  0x30   :  { %v166_v28 = vpop.eup %165 }
  0x31   :  { %v66_v30 = vsel %vm65_vm1, %v59_v21, %v64_v27  ;;  %v71_v31 = vmul.f32 %v166_v28, %v62_v24 }
  0x32   :  { %v69_v32 = vsel %vm67_vm2, %v68_v26, %v66_v30 }
  0x33   :  { %v73_v33 = vsel %vm72_vm3, %v62_v24, %v71_v31  ;;  %v77_v34 = vsel %vm33_vm0, %v69_v32, 0.0 }
  0x34   :  { %v76_v35 = vsel %vm74_vm4, %v75_v29, %v73_v33  ;;  %v78_v36 = vrot.slane %v77_v34, 4 }
  0x35   :  { %v84_v37 = vsel %vm33_vm0, %v76_v35, 0.0 }
  0x36   :  { %v79_v38 = vadd.f32 %v78_v36, %v77_v34  ;;  %v85_v39 = vrot.slane %v84_v37, 4 }
  0x38   :  { %v80_v40 = vrot.slane %v79_v38, 2  ;;  %v86_v41 = vadd.f32 %v85_v39, %v84_v37 }
  0x3a   :  { %v81_v42 = vadd.f32 %v80_v40, %v79_v38  ;;  %v87_v43 = vrot.slane %v86_v41, 2 }
  0x3c   :  { %v82_v44 = vrot.slane %v81_v42, 1  ;;  %v88_v45 = vadd.f32 %v87_v43, %v86_v41 }
  0x3e   :  { %v83_v49 = vadd.f32 %v82_v44, %v81_v42  ;;  %v89_v50 = vrot.slane %v88_v45, 1 }
  0x40   :  { %v90_v51 = vadd.f32 %v89_v50, %v88_v45  ;;  %v92_v52 = vmul.f32 0.25, %v83_v49 }
  0x42   :  { %v93_v55 = vmul.f32 0.25, %v90_v51 }
  0x44   :  { %v96_v56 = vcombine.low %v92_v52, %v93_v55 }
  0x46   :  { %v98_v58 = vadd.f32 %v96_v56, %v245_v0  ;;  %v99_v59 = vadd.f32 %v96_v56, %v247_v1 }
  0x48   :  { %v108_v60 = vrot.slane %v98_v58, %v107_v57  ;;  %v122_v61 = vrot.slane %v99_v59, %v107_v57 }
  0x4a   :  { %v115_v62 = vrot.slane %v108_v60, %v107_v57  ;;  %v129_v63 = vrot.slane %v122_v61, %v107_v57 }
  0x4c   :  { %136 = vst.msk [vmem:[#allocation5] ss:$4 sm:$0x3] %vm134_vm5, %v115_v62  ;;  %138 = vst.msk [vmem:[#allocation5 + $0x8] ss:$4 sm:$0x3] %vm134_vm5, %v129_v63 }
  0x4d   :  { %200 = shalt.err (!%p197_p12)
}
  0x4e   :  { %s201_s24 = scalar_lea.hbm %s287_s1, 256 }
  0x4f   :  { %p202_p13 = scmp.ne.s32.totalorder %s287_s1, %s201_s24  ;;  %p205_p0 = scmp.lt.u32.totalorder %s201_s24, %s287_s1 }
  0x51   :  { %p207_p1 = pnand %p205_p0, %p202_p13 }
  0x53   :  { %210 = shalt.err (!%p207_p1)
}
  0x54   :  { %150 = dma.vmem_to_hbm [thread:$0]  %s145_s20, 256, %s287_s1, [#allocation4], %s216_s16, %s216_s16, %s217_s17  }
  0x55   :  { %213 = dma.done.wait [#allocation4], 256  }
  0x56   :  { %214 = vsyncadd [#allocation4], 4294967040 }
  0x57   :  { %154 = vsyncpa [#allocation3], 1 }
  0x58   :  { %155 = vsyncpa [#allocation4], 1 }

</bundles_post_ra>
